<compile_context>
chip_gen: v6e
topology: v6e:2x2x1
jax: 0.10.0
libtpu: 0.0.40
codegen_flags: <defaults>
</compile_context>

<pallas_src>
import jax
import jax.numpy as jnp
from jax import lax
from jax.experimental import pallas as pl
from jax.experimental.pallas import tpu as pltpu

INPUT_SIZE = 4    # CartPole-v1 observation_space.shape[0]
HIDDEN = 64
OUTPUT_SIZE = 2   # CartPole-v1 action_space.n
LANE = 128        # TPU vreg lane width
CHUNK = 512       # inner lane-chunk: multiple of LANE; (64, CHUNK) f32 = 32 vregs


def _round_up(n, m):
    return ((n + m - 1) // m) * m


def _cdiv(a, b):
    return (a + b - 1) // b


def policy_kernel(xt_ref, w1a_ref, wd2_ref, bd2_ref, out_ref):
    # xt : (5, Bt)  = [x^T ; ones]          (batch on lanes, bias column folded in)
    # w1a: (64, 5)  = [w1 | b1]
    # wd2: (2, 64)  = [[w2[0]-w2[1]], [w2[1]-w2[0]]]   (logit-difference rows)
    # bd2: (2, 1)   = [[b2[0]-b2[1]], [b2[1]-b2[0]]]
    # out: (2, Bt)  softmax probabilities, batch on lanes.
    w1a = w1a_ref[...]          # hoisted: weights loaded once per grid step
    wd2 = wd2_ref[...]
    bd2 = bd2_ref[...]

    bt = out_ref.shape[1]
    n_chunks = bt // CHUNK      # static (Bt is a multiple of CHUNK)

    def body(c, carry):
        off = pl.multiple_of(c * CHUNK, CHUNK)
        xc = xt_ref[:, pl.ds(off, CHUNK)]                              # (5, CHUNK)
        # fc + bias (folded) + ReLU; hidden stays in vregs (32 vregs), never hits VMEM.
        h = jnp.dot(w1a, xc, preferred_element_type=jnp.float32)      # (64, CHUNK)
        h = jnp.maximum(h, 0.0)
        # 2-class softmax == sigmoid of the per-class logit difference (exact identity).
        dd = jnp.dot(wd2, h, preferred_element_type=jnp.float32) + bd2  # (2, CHUNK)
        p = pl.reciprocal(1.0 + jnp.exp(-dd), approx=False)           # exact, no 1-p cancel
        out_ref[:, pl.ds(off, CHUNK)] = p                             # single store per chunk
        return carry

    lax.fori_loop(0, n_chunks, body, 0, unroll=min(4, n_chunks))


def _pick_tiles(batch, block_b):
    """Tile the (chunk-aligned) batch: minimal padding, >=2 grid steps when possible."""
    groups = _cdiv(max(batch, 1), CHUNK)            # number of 512-lane chunk groups
    target = max(1, _cdiv(groups * CHUNK, block_b))
    if groups >= 2:
        target = max(2, target)                     # keep both v7x TensorCores busy
    groups_per_tile = _cdiv(groups, target)
    n_tiles = _cdiv(groups, groups_per_tile)        # drop any fully-empty tiles
    bt = groups_per_tile * CHUNK
    return n_tiles, bt


def policy_forward(x, w1, b1, w2, b2, *, block_b=32768):
    """x: (B, 4); w1: (64, 4); b1: (64,); w2: (2, 64); b2: (2,)  -- PyTorch nn.Linear layout.

    block_b: target batch-tile width.  Per-tile VMEM is ~56 bytes/batch element
    (double-buffered x^T + output only; the hidden never touches VMEM), so the
    default 32768 is comfortable on v5e/v6e/v7x default scoped-VMEM limits."""
    assert w1.shape == (HIDDEN, INPUT_SIZE)
    assert w2.shape == (OUTPUT_SIZE, HIDDEN) and OUTPUT_SIZE == 2
    B = x.shape[0]
    x = x.astype(jnp.float32)

    n_tiles, Bt = _pick_tiles(B, block_b)
    B_pad = n_tiles * Bt
    grid = (n_tiles,)

    # Lane-dense layout with the bias column folded in: xt = [x^T ; 1], zero-padded
    # batch columns (padded columns produce finite garbage that is sliced away).
    xt = jnp.concatenate([x.T, jnp.ones((1, B), jnp.float32)], axis=0)   # (5, B)
    xt = jnp.pad(xt, ((0, 0), (0, B_pad - B)))                           # (5, B_pad)

    # Parameter plumbing (done once, outside the kernel):
    w1a = jnp.concatenate(
        [w1.astype(jnp.float32), b1.astype(jnp.float32).reshape(HIDDEN, 1)], axis=1
    )                                                                     # (64, 5)
    wd2 = jnp.stack([w2[0] - w2[1], w2[1] - w2[0]]).astype(jnp.float32)   # (2, 64)
    bd2 = jnp.stack([b2[0] - b2[1], b2[1] - b2[0]]).astype(jnp.float32).reshape(2, 1)

    const = lambda i: (0, 0)  # weights/biases: same block every step -> fetched once
    out_t = pl.pallas_call(
        policy_kernel,
        out_shape=jax.ShapeDtypeStruct((OUTPUT_SIZE, B_pad), jnp.float32),
        grid=grid,
        in_specs=[
            pl.BlockSpec((INPUT_SIZE + 1, Bt), lambda i: (0, i)),   # x^T tile, streamed
            pl.BlockSpec((HIDDEN, INPUT_SIZE + 1), const),          # [w1 | b1]
            pl.BlockSpec((OUTPUT_SIZE, HIDDEN), const),             # logit-diff weights
            pl.BlockSpec((OUTPUT_SIZE, 1), const),                  # logit-diff biases
        ],
        out_specs=pl.BlockSpec((OUTPUT_SIZE, Bt), lambda i: (0, i)),
        compiler_params=pltpu.CompilerParams(
            dimension_semantics=("parallel",),                      # megacore split on v7x
        ),
    )(xt, w1a, wd2, bd2)

    # Back to (B, 2) row-major, dropping padded batch columns.
    return out_t[:, :B].T


def init_params(key):
    """Deterministic init matching nn.Linear default (uniform(-1/sqrt(fan_in), 1/sqrt(fan_in)))."""
    k1, k2, k3, k4 = jax.random.split(key, 4)
    bound1 = 1.0 / jnp.sqrt(float(INPUT_SIZE))
    bound2 = 1.0 / jnp.sqrt(float(HIDDEN))
    w1 = jax.random.uniform(k1, (HIDDEN, INPUT_SIZE), jnp.float32, -bound1, bound1)
    b1 = jax.random.uniform(k2, (HIDDEN,), jnp.float32, -bound1, bound1)
    w2 = jax.random.uniform(k3, (OUTPUT_SIZE, HIDDEN), jnp.float32, -bound2, bound2)
    b2 = jax.random.uniform(k4, (OUTPUT_SIZE,), jnp.float32, -bound2, bound2)
    return w1, b1, w2, b2


def policy_ref(x, w1, b1, w2, b2):
    h = jnp.maximum(x @ w1.T + b1, 0.0)
    logits = h @ w2.T + b2
    return jax.nn.softmax(logits, axis=-1)


if __name__ == "__main__":
    key = jax.random.PRNGKey(0)
    k_x, k_p = jax.random.split(key)
    w1, b1, w2, b2 = init_params(k_p)

    # Small RL-style batch (single tile, single chunk).
    B = 8
    x = jax.random.normal(k_x, (B, INPUT_SIZE), jnp.float32)
    out = jax.block_until_ready(policy_forward(x, w1, b1, w2, b2))
    ref = policy_ref(x, w1, b1, w2, b2)
    assert out.shape == (B, OUTPUT_SIZE)
    assert bool(jnp.all(jnp.isfinite(out)))
    assert bool(jnp.allclose(jnp.sum(out, axis=-1), 1.0, atol=1e-5))
    assert bool(jnp.allclose(out, ref, atol=1e-5, rtol=1e-5))

    # Ragged batch: pads to one 512-lane chunk, single grid step.
    B2 = 300
    x2 = jax.random.normal(jax.random.PRNGKey(1), (B2, INPUT_SIZE), jnp.float32)
    out2 = jax.block_until_ready(policy_forward(x2, w1, b1, w2, b2))
    ref2 = policy_ref(x2, w1, b1, w2, b2)
    assert out2.shape == (B2, OUTPUT_SIZE)
    assert bool(jnp.allclose(out2, ref2, atol=1e-5, rtol=1e-5))
    assert bool(jnp.allclose(jnp.sum(out2, axis=-1), 1.0, atol=1e-5))

    # Multi-tile path: small block_b forces a 3-step grid + per-chunk fused loop.
    B3 = 1200
    x3 = jax.random.normal(jax.random.PRNGKey(2), (B3, INPUT_SIZE), jnp.float32)
    out3 = jax.block_until_ready(policy_forward(x3, w1, b1, w2, b2, block_b=512))
    ref3 = policy_ref(x3, w1, b1, w2, b2)
    assert out3.shape == (B3, OUTPUT_SIZE)
    assert bool(jnp.allclose(out3, ref3, atol=1e-5, rtol=1e-5))
    assert bool(jnp.allclose(jnp.sum(out3, axis=-1), 1.0, atol=1e-5))

    print("KERNEL_OK")
</pallas_src>

<mosaic_0001>
module attributes {stable_mosaic.version = 11 : i64} {
  func.func @policy_kernel(%arg0: i32, %arg1: memref<5x512xf32, #tpu.memory_space<vmem>>, %arg2: memref<64x5xf32, #tpu.memory_space<vmem>>, %arg3: memref<2x64xf32, #tpu.memory_space<vmem>>, %arg4: memref<2x1xf32, #tpu.memory_space<vmem>>, %arg5: memref<2x512xf32, #tpu.memory_space<vmem>>) attributes {dimension_semantics = [#tpu.dimension_semantics<parallel>], iteration_bounds = array<i64: 1>, scalar_prefetch = 0 : i64, scratch_operands = 0 : i64, tpu.core_type = #tpu.core_type<tc>, window_params = [{transform_indices = @transform_0, window_bounds = array<i64: 5, 512>}, {pipeline_mode = #tpu.pipeline_mode<synchronous>, transform_indices = @transform_1, window_bounds = array<i64: 64, 5>}, {pipeline_mode = #tpu.pipeline_mode<synchronous>, transform_indices = @transform_2, window_bounds = array<i64: 2, 64>}, {pipeline_mode = #tpu.pipeline_mode<synchronous>, transform_indices = @transform_3, window_bounds = array<i64: 2, 1>}, {transform_indices = @transform_4, window_bounds = array<i64: 2, 512>}]} {
    %c0 = arith.constant 0 : index
    %c0_0 = arith.constant 0 : index
    %0 = vector.load %arg2[%c0, %c0_0] : memref<64x5xf32, #tpu.memory_space<vmem>>, vector<64x5xf32>
    %c0_1 = arith.constant 0 : index
    %c0_2 = arith.constant 0 : index
    %1 = vector.load %arg3[%c0_1, %c0_2] : memref<2x64xf32, #tpu.memory_space<vmem>>, vector<2x64xf32>
    %c0_3 = arith.constant 0 : index
    %c0_4 = arith.constant 0 : index
    %2 = vector.load %arg4[%c0_3, %c0_4] : memref<2x1xf32, #tpu.memory_space<vmem>>, vector<2x1xf32>
    %c0_i32 = arith.constant 0 : i32
    %c512_i32 = arith.constant 512 : i32
    %3 = arith.muli %c0_i32, %c512_i32 : i32
    %4 = tpu.assume_multiple %3, 512 : i32
    %c0_5 = arith.constant 0 : index
    %5 = arith.index_cast %4 : i32 to index
    %6 = vector.load %arg1[%c0_5, %5] : memref<5x512xf32, #tpu.memory_space<vmem>>, vector<5x512xf32>
    %cst = arith.constant dense<0.000000e+00> : vector<64x512xf32>
    %7 = tpu.matmul %0, %6, %cst {dimension_numbers = #tpu.dot_dimension_numbers<[1], [0], [0], [1], [0, 0, 1, 1], [], []>} : vector<64x5xf32>, vector<5x512xf32>, vector<64x512xf32> -> vector<64x512xf32>
    %cst_6 = arith.constant 0.000000e+00 : f32
    %8 = vector.broadcast %cst_6 : f32 to vector<64x512xf32>
    %9 = arith.maximumf %7, %8 : vector<64x512xf32>
    %cst_7 = arith.constant dense<0.000000e+00> : vector<2x512xf32>
    %10 = tpu.matmul %1, %9, %cst_7 {dimension_numbers = #tpu.dot_dimension_numbers<[1], [0], [0], [1], [0, 0, 1, 1], [], []>} : vector<2x64xf32>, vector<64x512xf32>, vector<2x512xf32> -> vector<2x512xf32>
    %11 = vector.broadcast %2 : vector<2x1xf32> to vector<2x512xf32>
    %12 = arith.addf %10, %11 : vector<2x512xf32>
    %cst_8 = arith.constant 0.000000e+00 : f32
    %13 = vector.broadcast %cst_8 : f32 to vector<2x512xf32>
    %14 = arith.subf %13, %12 : vector<2x512xf32>
    %15 = math.exp %14 : vector<2x512xf32>
    %cst_9 = arith.constant 1.000000e+00 : f32
    %16 = vector.broadcast %cst_9 : f32 to vector<2x512xf32>
    %17 = arith.addf %16, %15 : vector<2x512xf32>
    %18 = tpu.reciprocal %17 : vector<2x512xf32> -> vector<2x512xf32>
    %c0_10 = arith.constant 0 : index
    %19 = arith.index_cast %4 : i32 to index
    %20 = vector.load %arg5[%c0_10, %19] : memref<2x512xf32, #tpu.memory_space<vmem>>, vector<2x512xf32>
    tpu.vector_store %arg5[%c0_10, %19], %18 {strides = array<i32>} : memref<2x512xf32, #tpu.memory_space<vmem>>, vector<2x512xf32>,
    %c1_i32 = arith.constant 1 : i32
    return
  }
  func.func @transform_0(%arg0: i32) -> (i32, i32) {
    %c0_i32 = arith.constant 0 : i32
    %c0_i32_0 = arith.constant 0 : i32
    return %c0_i32, %arg0 : i32, i32
  }
  func.func @transform_1(%arg0: i32) -> (i32, i32) {
    %c0_i32 = arith.constant 0 : i32
    %c0_i32_0 = arith.constant 0 : i32
    %c0_i32_1 = arith.constant 0 : i32
    return %c0_i32, %c0_i32_0 : i32, i32
  }
  func.func @transform_2(%arg0: i32) -> (i32, i32) {
    %c0_i32 = arith.constant 0 : i32
    %c0_i32_0 = arith.constant 0 : i32
    %c0_i32_1 = arith.constant 0 : i32
    return %c0_i32, %c0_i32_0 : i32, i32
  }
  func.func @transform_3(%arg0: i32) -> (i32, i32) {
    %c0_i32 = arith.constant 0 : i32
    %c0_i32_0 = arith.constant 0 : i32
    %c0_i32_1 = arith.constant 0 : i32
    return %c0_i32, %c0_i32_0 : i32, i32
  }
  func.func @transform_4(%arg0: i32) -> (i32, i32) {
    %c0_i32 = arith.constant 0 : i32
    %c0_i32_0 = arith.constant 0 : i32
    return %c0_i32, %arg0 : i32, i32
  }
}

</mosaic_0001>

<bundles_post_ra>
// kernel: tpu_custom_call.1
= control target key start
LH: loop header
LB: loop body
LE: loop exit
PB: predicated region body
PF: predicated region fallthrough
CT: control target
= control target key end

     0   :  { %vm57_vm0 = vcmask 1044480   ;;  %vm32_vm1 = vcmask 39936   ;;  %v601_v5 = vmov 0.0   ;;  %s727_s0 = inlined_call_operand.vmem [shape: f32[5,512], index: 0, kind: input, shape index: {}]   ;;  %s728_s1 = inlined_call_operand.vmem [shape: f32[64,5], index: 1, kind: input, shape index: {}]   ;;  %s729_s2 = inlined_call_operand.vmem [shape: f32[2,64], index: 2, kind: input, shape index: {}]   ;;  %s730_s3 = inlined_call_operand.vmem [shape: f32[2,1], index: 3, kind: input, shape index: {}]   ;;  %s731_s4 = inlined_call_operand.hbm [shape: f32[2,512], index: 4, kind: output, shape index: {}]  }
   0x1   :  { %v29_v0 = vld [vmem:[%s727_s0 + $0x8] sm:$0x1f]  ;;  %v31_v1 = vld [vmem:[%s727_s0 + $0x18] sm:$0x1f]  ;;  %v28_v2 = vld [vmem:[%s727_s0] sm:$0x1f]  ;;  %134 = vmatprep.mubr.f32.mxu0 %v601_v5  ;;  %247 = vmatprep.mubr.f32.mxu1 %v601_v5 }
   0x2   :  { %536 = vmatprep.subr.msk.mxu0 %vm57_vm0, %v29_v0  ;;  %546 = vmatprep.subr.msk.mxu1 %vm57_vm0, %v31_v1  ;;  %v30_v3 = vld [vmem:[%s727_s0 + $0x10] sm:$0x1f]  ;;  %v18_v4 = vld [vmem:[%s728_s1] sm:$0xff] }
   0x3   :  { %537 = vmatpush1.msk.msra.mxu0 %vm57_vm0, %v28_v2  ;;  %547 = vmatpush1.msk.msra.mxu1 %vm57_vm0, %v30_v3 }
   0x4   :  { %538 = vmatmul.mubr.msk.f32.vlgmr.msra.gmra.mxu0 %vm32_vm1, %v18_v4  ;;  %548 = vmatmul.mubr.msk.f32.vlgmr.msra.gmra.mxu1 %vm32_vm1, %v18_v4 }
   0x5   :  { %9 = vsyncpa [#allocation3], 0  ;;  %140 = vmatprep.mubr.f32.mxu0 %v601_v5  ;;  %253 = vmatprep.mubr.f32.mxu1 %v601_v5  ;;  %v19_v6 = vld [vmem:[%s728_s1 + $0x8] sm:$0xff]  ;;  %v20_v7 = vld [vmem:[%s728_s1 + $0x10] sm:$0xff]  ;;  %v602_v14 = vmov 0   ;;  %vm333_vm2 = vcmask 523264  }
   0x6   :  { %v21_v8 = vld [vmem:[%s728_s1 + $0x18] sm:$0xff]  ;;  %v22_v9 = vld [vmem:[%s728_s1 + $0x20] sm:$0xff]  ;;  %v23_v10 = vld [vmem:[%s728_s1 + $0x28] sm:$0xff]  ;;  %562 = vset.pattern.permute.xlu0 %v602_v14 }
   0x7   :  { %v24_v11 = vld [vmem:[%s728_s1 + $0x30] sm:$0xff]  ;;  %v25_v12 = vld [vmem:[%s728_s1 + $0x38] sm:$0xff]  ;;  %v27_v13 = vld [vmem:[%s730_s3] sm:$0x3] }
   0x8   :  { %539 = vmatmul.mubr.msk.f32.gmra.mxu0 %vm32_vm1, %v19_v6  ;;  %549 = vmatmul.mubr.msk.f32.gmra.mxu1 %vm32_vm1, %v19_v6 }
   0x9   :  { %146 = vmatprep.mubr.f32.mxu0 %v601_v5  ;;  %259 = vmatprep.mubr.f32.mxu1 %v601_v5 }
   0xa   :  { %330 = vperm.xlu0 %562, %v27_v13  }
   0xc   :  { %540 = vmatmul.mubr.msk.f32.gmra.mxu0 %vm32_vm1, %v20_v7  ;;  %550 = vmatmul.mubr.msk.f32.gmra.mxu1 %vm32_vm1, %v20_v7 }
   0xd   :  { %152 = vmatprep.mubr.f32.mxu0 %v601_v5  ;;  %265 = vmatprep.mubr.f32.mxu1 %v601_v5 }
  0x10   :  { %541 = vmatmul.mubr.msk.f32.gmra.mxu0 %vm32_vm1, %v21_v8  ;;  %551 = vmatmul.mubr.msk.f32.gmra.mxu1 %vm32_vm1, %v21_v8 }
  0x11   :  { %158 = vmatprep.mubr.f32.mxu0 %v601_v5  ;;  %271 = vmatprep.mubr.f32.mxu1 %v601_v5 }
  0x14   :  { %542 = vmatmul.mubr.msk.f32.gmra.mxu0 %vm32_vm1, %v22_v9  ;;  %552 = vmatmul.mubr.msk.f32.gmra.mxu1 %vm32_vm1, %v22_v9 }
  0x15   :  { %164 = vmatprep.mubr.f32.mxu0 %v601_v5  ;;  %277 = vmatprep.mubr.f32.mxu1 %v601_v5 }
  0x18   :  { %543 = vmatmul.mubr.msk.f32.gmra.mxu0 %vm32_vm1, %v23_v10  ;;  %553 = vmatmul.mubr.msk.f32.gmra.mxu1 %vm32_vm1, %v23_v10 }
  0x19   :  { %170 = vmatprep.mubr.f32.mxu0 %v601_v5  ;;  %283 = vmatprep.mubr.f32.mxu1 %v601_v5 }
  0x1c   :  { %544 = vmatmul.mubr.msk.f32.gmra.mxu0 %vm32_vm1, %v24_v11  ;;  %554 = vmatmul.mubr.msk.f32.gmra.mxu1 %vm32_vm1, %v24_v11 }
  0x1d   :  { %176 = vmatprep.mubr.f32.mxu0 %v601_v5  ;;  %289 = vmatprep.mubr.f32.mxu1 %v601_v5 }
  0x20   :  { %545 = vmatmul.mubr.msk.f32.gmra.mxu0 %vm32_vm1, %v25_v12  ;;  %555 = vmatmul.mubr.msk.f32.gmra.mxu1 %vm32_vm1, %v25_v12 }
  0x21   :  { %401 = vmatprep.mubr.f32.mxu0 %v601_v5  ;;  %472 = vmatprep.mubr.f32.mxu1 %v601_v5 }
  0xc4   :  { %v685_v15 = vpop.f32.mrf.mxu0  ;;  %v687_v16 = vpop.f32.mrf.mxu1 }
  0xc5   :  { %v296_v13 = vmax.f32 %v685_v15, 0.0  ;;  %v298_v14 = vmax.f32 %v687_v16, 0.0 }
  0xc6   :  { %v689_v17 = vpop.f32.mrf.mxu0  ;;  %v691_v18 = vpop.f32.mrf.mxu1 }
  0xc7   :  { %v297_v11 = vmax.f32 %v689_v17, 0.0  ;;  %v299_v12 = vmax.f32 %v691_v18, 0.0  ;;  %v331_v17 = vpop.permute.xlu0 %330 }
  0xc8   :  { %v693_v19 = vpop.f32.mrf.mxu0  ;;  %v695_v20 = vpop.f32.mrf.mxu1 }
  0xc9   :  { %v300_v9 = vmax.f32 %v693_v19, 0.0  ;;  %v302_v10 = vmax.f32 %v695_v20, 0.0  ;;  %v26_v19 = vld [vmem:[%s729_s2] sm:$0x3]  ;;  %s604_s2 = smov [#allocation2]  }
  0xca   :  { %v697_v21 = vpop.f32.mrf.mxu0  ;;  %v699_v22 = vpop.f32.mrf.mxu1  ;;  %s528_s14 = sshll.u32 %s604_s2, 4  ;;  %s529_s14 = int_to_ptr.vmem [resolvable:$true] %s528_s14 }
  0xcb   :  { %v301_v7 = vmax.f32 %v697_v21, 0.0  ;;  %v303_v8 = vmax.f32 %v699_v22, 0.0  ;;  %s579_s15 = scalar_lea.vmem %s529_s14, 128  ;;  %p584_p1 = scmp.lt.s32.totalorder %s529_s14, %s529_s14 }
  0xcc   :  { %v701_v23 = vpop.f32.mrf.mxu0  ;;  %v703_v24 = vpop.f32.mrf.mxu1  ;;  %p580_p0 = scmp.ne.s32.totalorder %s529_s14, %s579_s15  ;;  %p585_p2 = scmp.lt.s32.totalorder %s579_s15, %s579_s15 }
  0xcd   :  { %v304_v5 = vmax.f32 %v701_v23, 0.0  ;;  %v306_v6 = vmax.f32 %v703_v24, 0.0 }
  0xce   :  { %v705_v25 = vpop.f32.mrf.mxu0  ;;  %v707_v26 = vpop.f32.mrf.mxu1  ;;  %p586_p3 = por %p585_p2, %p584_p1 }
  0xcf   :  { %v305_v3 = vmax.f32 %v705_v25, 0.0  ;;  %v307_v4 = vmax.f32 %v707_v26, 0.0 }
  0xd0   :  { %v154_v27 = vpop.f32.mrf.mxu0  ;;  %v267_v28 = vpop.f32.mrf.mxu1  ;;  %p587_p4 = pnand %p586_p3, %p580_p0 }
  0xd1   :  { %v308_v1 = vmax.f32 %v154_v27, 0.0  ;;  %v310_v2 = vmax.f32 %v267_v28, 0.0 }
  0xd2   :  { %v156_v29 = vpop.f32.mrf.mxu0  ;;  %v269_v30 = vpop.f32.mrf.mxu1 }
  0xd3   :  { %v309_v63 = vmax.f32 %v156_v29, 0.0  ;;  %v311_v0 = vmax.f32 %v269_v30, 0.0 }
  0xd4   :  { %v160_v31 = vpop.f32.mrf.mxu0  ;;  %v273_v32 = vpop.f32.mrf.mxu1 }
  0xd5   :  { %v312_v61 = vmax.f32 %v160_v31, 0.0  ;;  %v314_v62 = vmax.f32 %v273_v32, 0.0 }
  0xd6   :  { %v162_v33 = vpop.f32.mrf.mxu0  ;;  %v275_v34 = vpop.f32.mrf.mxu1 }
  0xd7   :  { %v313_v59 = vmax.f32 %v162_v33, 0.0  ;;  %v315_v60 = vmax.f32 %v275_v34, 0.0 }
  0xd8   :  { %v166_v35 = vpop.f32.mrf.mxu0  ;;  %v279_v36 = vpop.f32.mrf.mxu1 }
  0xd9   :  { %v316_v57 = vmax.f32 %v166_v35, 0.0  ;;  %v318_v58 = vmax.f32 %v279_v36, 0.0 }
  0xda   :  { %v168_v37 = vpop.f32.mrf.mxu0  ;;  %v281_v38 = vpop.f32.mrf.mxu1 }
  0xdb   :  { %v317_v55 = vmax.f32 %v168_v37, 0.0  ;;  %v319_v56 = vmax.f32 %v281_v38, 0.0 }
  0xdc   :  { %v172_v39 = vpop.f32.mrf.mxu0  ;;  %v285_v40 = vpop.f32.mrf.mxu1 }
  0xdd   :  { %v320_v53 = vmax.f32 %v172_v39, 0.0  ;;  %v322_v54 = vmax.f32 %v285_v40, 0.0 }
  0xde   :  { %v174_v41 = vpop.f32.mrf.mxu0  ;;  %v287_v42 = vpop.f32.mrf.mxu1 }
  0xdf   :  { %v321_v51 = vmax.f32 %v174_v41, 0.0  ;;  %v323_v52 = vmax.f32 %v287_v42, 0.0  ;;  %v603_v41 = vmov 1983009808  }
  0xe0   :  { %v178_v43 = vpop.f32.mrf.mxu0  ;;  %v291_v44 = vpop.f32.mrf.mxu1  ;;  %v506_v42 = vunpack.c.l.s4 %v603_v41 }
  0xe1   :  { %v324_v49 = vmax.f32 %v178_v43, 0.0  ;;  %v326_v50 = vmax.f32 %v291_v44, 0.0  ;;  %v508_v43 = vlaneseq }
  0xe2   :  { %v180_v45 = vpop.f32.mrf.mxu0  ;;  %v293_v46 = vpop.f32.mrf.mxu1  ;;  %v507_v44 = vunpack.c.0.s8 %v506_v42 }
  0xe3   :  { %v325_v47 = vmax.f32 %v180_v45, 0.0  ;;  %v327_v48 = vmax.f32 %v293_v46, 0.0  ;;  %v509_v45 = vshrl.u32 %v508_v43, 7 }
  0xe5   :  { %353 = vmatprep.subr.mxu0 %v325_v47  ;;  %424 = vmatprep.subr.mxu1 %v327_v48  ;;  %v510_v48 = vsub.s32 %v507_v44, %v509_v45 }
  0xe6   :  { %354 = vmatpush1.msra.mxu0 %v324_v49  ;;  %425 = vmatpush1.msra.mxu1 %v326_v50 }
  0xe7   :  { %355 = vmatprep.subr.mxu0 %v321_v51  ;;  %426 = vmatprep.subr.mxu1 %v323_v52 }
  0xe8   :  { %356 = vmatpush1.msra.mxu0 %v320_v53  ;;  %427 = vmatpush1.msra.mxu1 %v322_v54 }
  0xe9   :  { %357 = vmatprep.subr.mxu0 %v317_v55  ;;  %428 = vmatprep.subr.mxu1 %v319_v56 }
  0xea   :  { %358 = vmatpush1.msra.mxu0 %v316_v57  ;;  %429 = vmatpush1.msra.mxu1 %v318_v58 }
  0xeb   :  { %359 = vmatprep.subr.mxu0 %v313_v59  ;;  %430 = vmatprep.subr.mxu1 %v315_v60 }
  0xec   :  { %360 = vmatpush1.msra.mxu0 %v312_v61  ;;  %431 = vmatpush1.msra.mxu1 %v314_v62 }
  0xed   :  { %361 = vmatprep.subr.mxu0 %v309_v63  ;;  %432 = vmatprep.subr.mxu1 %v311_v0 }
  0xee   :  { %362 = vmatpush1.msra.mxu0 %v308_v1  ;;  %433 = vmatpush1.msra.mxu1 %v310_v2 }
  0xef   :  { %363 = vmatprep.subr.mxu0 %v305_v3  ;;  %434 = vmatprep.subr.mxu1 %v307_v4 }
  0xf0   :  { %364 = vmatpush1.msra.mxu0 %v304_v5  ;;  %435 = vmatpush1.msra.mxu1 %v306_v6 }
  0xf1   :  { %365 = vmatprep.subr.mxu0 %v301_v7  ;;  %436 = vmatprep.subr.mxu1 %v303_v8 }
  0xf2   :  { %366 = vmatpush1.msra.mxu0 %v300_v9  ;;  %437 = vmatpush1.msra.mxu1 %v302_v10 }
  0xf3   :  { %367 = vmatprep.subr.mxu0 %v297_v11  ;;  %438 = vmatprep.subr.mxu1 %v299_v12 }
  0xf4   :  { %368 = vmatpush1.msra.mxu0 %v296_v13  ;;  %439 = vmatpush1.msra.mxu1 %v298_v14 }
  0xf5   :  { %556 = vmatmul.mubr.msk.f32.vlgmr.msra.gmra.mxu0 %vm333_vm2, %v26_v19  ;;  %557 = vmatmul.mubr.msk.f32.vlgmr.msra.gmra.mxu1 %vm333_vm2, %v26_v19 }
 0x1b5   :  { %v403_v18 = vpop.f32.mrf.mxu0  ;;  %v474_v20 = vpop.f32.mrf.mxu1 }
 0x1b6   :  { %v404_v21 = vadd.f32 %v403_v18, %v331_v17  ;;  %v475_v15 = vadd.f32 %v474_v20, %v331_v17 }
 0x1b7   :  { %v405_v22 = vpop.f32.mrf.mxu0  ;;  %v476_v16 = vpop.f32.mrf.mxu1 }
 0x1b8   :  { %v479_v23 = vsub.f32 0.0, %v404_v21  ;;  %v481_v24 = vsub.f32 0.0, %v475_v15  ;;  %v406_v25 = vadd.f32 %v405_v22, %v331_v17  ;;  %v477_v26 = vadd.f32 %v476_v16, %v331_v17 }
 0x1ba   :  { %v483_v27 = vmul.f32 1.442695, %v479_v23  ;;  %v487_v28 = vmul.f32 1.442695, %v481_v24  ;;  %v480_v29 = vsub.f32 0.0, %v406_v25  ;;  %v482_v30 = vsub.f32 0.0, %v477_v26 }
 0x1bc   :  { %563 = vpow2.f32 %v483_v27  ;;  %v485_v31 = vmul.f32 1.442695, %v480_v29  ;;  %v489_v32 = vmul.f32 1.442695, %v482_v30 }
 0x1bd   :  { %565 = vpow2.f32 %v487_v28 }
 0x1be   :  { %567 = vpow2.f32 %v485_v31 }
 0x1bf   :  { %569 = vpow2.f32 %v489_v32 }
 0x1c9   :  { %v564_v33 = vpop.eup %563 }
 0x1ca   :  { %v566_v34 = vpop.eup %565  ;;  %v491_v35 = vadd.f32 1.0, %v564_v33 }
 0x1cb   :  { %v568_v36 = vpop.eup %567  ;;  %v493_v37 = vadd.f32 1.0, %v566_v34 }
 0x1cc   :  { %v570_v38 = vpop.eup %569  ;;  %571 = vrcp.f32 %v491_v35  ;;  %v492_v39 = vadd.f32 1.0, %v568_v36 }
 0x1cd   :  { %573 = vrcp.f32 %v493_v37  ;;  %v494_v40 = vadd.f32 1.0, %v570_v38 }
 0x1ce   :  { %575 = vrcp.f32 %v492_v39 }
 0x1cf   :  { %577 = vrcp.f32 %v494_v40 }
 0x1d9   :  { %v572_v46 = vpop.eup %571 }
 0x1da   :  { %v574_v47 = vpop.eup %573 }
 0x1db   :  { %v576_v49 = vpop.eup %575 }
 0x1dc   :  { %v578_v50 = vpop.eup %577  ;;  %v503_v51 = vcombine.low %v572_v46, %v576_v49 }
 0x1dd   :  { %v504_v52 = vcombine.low %v574_v47, %v578_v50 }
 0x1de   :  { %v511_v53 = vrot.slane %v503_v51, %v510_v48 }
 0x1df   :  { %v518_v54 = vrot.slane %v504_v52, %v510_v48 }
 0x1e1   :  { %v519_v55 = vcombine.low %v511_v53, %v518_v54 }
 0x1e3   :  { %521 = vst [vmem:[#allocation2] sm:$0xff] %v519_v55 }
 0x1e4   :  { %590 = shalt.err (!%p587_p4)
}
 0x1e5   :  { %531 = dma.vmem_to_hbm [thread:$0]  %s529_s14, 128, %s731_s4, [#allocation3]  }
 0x1e6   :  { %599 = dma.done.wait [#allocation3], 128  }
 0x1e7   :  { %600 = vsyncadd [#allocation3], 4294967168 }
 0x1e8   :  { %535 = vsyncpa [#allocation3], 1 }

</bundles_post_ra>
